<compile_context>
chip_gen: v7x
topology: tpu7x:2x2x1
jax: 0.10.0
libtpu: 0.0.40
codegen_flags: <defaults>
</compile_context>

<pallas_src>
import functools

import jax
import jax.numpy as jnp
from jax import lax
from jax.experimental import pallas as pl
from jax.experimental.pallas import tpu as pltpu

_LANE = 128
_SUB = 8


def _round_up(n, m):
    return ((n + m - 1) // m) * m


def _vmem_budget():
    """Returns (vmem_limit_bytes for CompilerParams, physical VMEM bytes)."""
    phys = 64 << 20  # v7x per-core VMEM = smallest across v5e/v6e/v7x
    try:
        phys = int(pltpu.get_tpu_info().vmem_capacity_bytes)
    except Exception:
        pass
    limit = max(32 << 20, min(100 << 20, (phys * 3) // 4))
    return limit, phys


def _linear_l1_partial_kernel(x_ref, w_ref, b_ref, part_ref, *,
                              tb, tail_valid, scale, needs_mask,
                              single_batch_tile):
    """One (dout-tile, batch-tile) step: MXU matmul + streamed |.+b| reduce
    into a lane-dense (8, 128) f32 partial (scale folded in)."""
    # MXU matmul, f32 accumulation.
    z = jnp.dot(x_ref[...], w_ref[...], preferred_element_type=jnp.float32)
    b = b_ref[...].astype(jnp.float32)  # (8, tn), pre-broadcast in the wrapper
    tn = z.shape[1]

    def reduce_to_part(valid_rows):
        # Stream 8-row groups of z through bias+abs(+tail mask) into up to 4
        # independent accumulators (keeps the VALU dependency chain short and
        # the live set to a couple of vregs per lane group).
        n_groups = (valid_rows + _SUB - 1) // _SUB
        n_acc = max(1, min(4, n_groups))
        accs = [None] * n_acc
        for g in range(n_groups):
            grp = jnp.abs(z[g * _SUB:(g + 1) * _SUB, :] + b)
            rem = valid_rows - g * _SUB
            if rem < _SUB:  # only the single straddling group is masked
                row = lax.broadcasted_iota(jnp.int32, grp.shape, 0)
                grp = jnp.where(row < rem, grp, 0.0)
            k = g % n_acc
            accs[k] = grp if accs[k] is None else accs[k] + grp
        vals = [a for a in accs if a is not None]
        while len(vals) > 1:  # pairwise tree combine
            nxt = [vals[p] + vals[p + 1] for p in range(0, len(vals) - 1, 2)]
            if len(vals) % 2:
                nxt.append(vals[-1])
            vals = nxt
        s = vals[0]  # (8, tn)

        # Fold lane groups -> (8, 128) with 128-aligned static slices (tree).
        lanes = [s[:, c * _LANE:(c + 1) * _LANE] for c in range(tn // _LANE)]
        while len(lanes) > 1:
            nxt = [lanes[p] + lanes[p + 1] for p in range(0, len(lanes) - 1, 2)]
            if len(lanes) % 2:
                nxt.append(lanes[-1])
            lanes = nxt
        part = lanes[0]
        if scale != 1.0:  # 'mean' 1/(B*D_out) folded in here
            part = part * scale
        return part

    if not needs_mask:
        # Fully aligned batch: interior and last tiles are identical, no mask.
        part_ref[...] = reduce_to_part(tb)
    elif single_batch_tile:
        # Only one batch tile and it is the (padded) last one.
        part_ref[...] = reduce_to_part(tail_valid)
    else:
        i = pl.program_id(1)
        last = pl.num_programs(1) - 1

        @pl.when(i == last)
        def _():
            part_ref[...] = reduce_to_part(tail_valid)

        @pl.when(i < last)
        def _():
            part_ref[...] = reduce_to_part(tb)


def model_with_loss_forward(x, weight_t, bias, loss_reduction="mean",
                            compute_dtype=None,
                            max_rows_per_tile=None, max_cols_per_tile=None):
    """x: (B, D_in).  weight_t: (D_in, D_out) (= torch weight.T).
    bias: (D_out,).  Returns the scalar L1-vs-zeros loss.

    compute_dtype: optional (e.g. jnp.bfloat16) matmul operand dtype; f32
    accumulation either way (looser tolerance vs. the f32 reference).
    max_rows_per_tile / max_cols_per_tile: optional caps (testing / tuning)."""
    if loss_reduction not in ("mean", "sum"):
        raise ValueError(f"Unsupported loss_reduction={loss_reduction}")

    B, D_in = x.shape
    D_in_w, D_out = weight_t.shape
    assert D_in_w == D_in
    assert bias.shape == (D_out,)

    x_dtype = compute_dtype if compute_dtype is not None else x.dtype
    w_dtype = compute_dtype if compute_dtype is not None else weight_t.dtype
    elt_x = jnp.dtype(x_dtype).itemsize
    elt_w = jnp.dtype(w_dtype).itemsize

    d_in_p = _round_up(D_in, _LANE)
    d_out_p = _round_up(D_out, _LANE)

    vmem_limit, vmem_phys = _vmem_budget()
    usable = int(vmem_limit * 0.8)  # headroom for compiler scratch / partials

    # ---- D_out tiling (keeps the W block VMEM-resident, single-buffered) ----
    w_budget = usable // 2
    cols_by_budget = max(_LANE,
                         (w_budget // max(1, d_in_p * elt_w)) // _LANE * _LANE)
    tn = min(d_out_p, cols_by_budget)
    if max_cols_per_tile is not None:
        tn = min(tn, max(_LANE, _round_up(max_cols_per_tile, _LANE)))
    d_out_p = _round_up(d_out_p, tn)  # padded W/bias cols are zero -> |0| = 0
    num_n_tiles = d_out_p // tn

    # ---- batch tiling (x double-buffered; bigger tiles on big-VMEM chips) ----
    x_budget = usable - d_in_p * tn * elt_w - _SUB * tn * 4
    rows_by_budget = max(_SUB,
                         (x_budget // max(1, 2 * d_in_p * elt_x)) // _SUB * _SUB)
    tb_cap = 256 if vmem_phys <= (64 << 20) else 512
    tb = min(tb_cap, _round_up(B, _SUB), rows_by_budget)
    if max_rows_per_tile is not None:
        tb = min(tb, max(_SUB, _round_up(max_rows_per_tile, _SUB)))
    b_p = _round_up(B, tb)
    num_b_tiles = b_p // tb
    tail_valid = B - (num_b_tiles - 1) * tb
    needs_mask = tail_valid != tb

    # ---- operand prep: pad / cast only when actually required ----
    if x.shape == (b_p, d_in_p) and x.dtype == x_dtype:
        x_p = x  # no extra HBM round-trip in the aligned case
    elif x.shape == (b_p, d_in_p):
        x_p = x.astype(x_dtype)
    else:
        x_p = jnp.zeros((b_p, d_in_p), x_dtype).at[:B, :D_in].set(
            x.astype(x_dtype))

    if weight_t.shape == (d_in_p, d_out_p) and weight_t.dtype == w_dtype:
        w_p = weight_t
    elif weight_t.shape == (d_in_p, d_out_p):
        w_p = weight_t.astype(w_dtype)
    else:
        w_p = jnp.zeros((d_in_p, d_out_p), w_dtype).at[:D_in, :D_out].set(
            weight_t.astype(w_dtype))

    if D_out == d_out_p:
        b_row = bias.astype(jnp.float32)
    else:
        b_row = jnp.zeros((d_out_p,), jnp.float32).at[:D_out].set(
            bias.astype(jnp.float32))
    # Pre-broadcast bias to 8 sublanes: no per-step broadcast_in_dim in-kernel.
    b8 = jnp.tile(b_row.reshape(1, d_out_p), (_SUB, 1))

    scale = (1.0 / (B * D_out)) if loss_reduction == "mean" else 1.0

    kernel = functools.partial(
        _linear_l1_partial_kernel,
        tb=tb, tail_valid=tail_valid, scale=scale, needs_mask=needs_mask,
        single_batch_tile=(num_b_tiles == 1))

    out_shape = jax.ShapeDtypeStruct(
        (num_b_tiles * _SUB, num_n_tiles * _LANE), jnp.float32)
    x_spec = pl.BlockSpec((tb, d_in_p), lambda j, i: (i, 0))
    out_spec = pl.BlockSpec((_SUB, _LANE), lambda j, i: (i, j))
    cparams = pltpu.CompilerParams(
        dimension_semantics=("parallel", "parallel"),  # 2 TCs split the grid
        vmem_limit_bytes=vmem_limit)

    def _run(single_buffer_weights):
        if single_buffer_weights:
            # W / bias are grid-invariant along the (inner) batch axis ->
            # single buffer halves their VMEM footprint.
            w_spec = pl.BlockSpec((d_in_p, tn), lambda j, i: (0, j),
                                  pipeline_mode=pl.Buffered(1))
            b_spec = pl.BlockSpec((_SUB, tn), lambda j, i: (0, j),
                                  pipeline_mode=pl.Buffered(1))
        else:
            w_spec = pl.BlockSpec((d_in_p, tn), lambda j, i: (0, j))
            b_spec = pl.BlockSpec((_SUB, tn), lambda j, i: (0, j))
        out = pl.pallas_call(
            kernel,
            out_shape=out_shape,
            grid_spec=pl.GridSpec(
                grid=(num_n_tiles, num_b_tiles),   # j outer (W resident), i inner
                in_specs=[x_spec, w_spec, b_spec],
                out_specs=out_spec),
            compiler_params=cparams,
        )(x_p, w_p, b8)
        return jax.block_until_ready(out)

    try:
        partials = _run(True)
    except Exception:
        # Fallback if this JAX build rejects pipeline_mode=Buffered(1).
        partials = _run(False)

    # Single tiny reduce of the lane-dense partials (scale already folded in).
    return jnp.sum(partials)


def _reference(x, weight_t, bias, loss_reduction):
    out = x @ weight_t + bias[None, :]
    return jnp.mean(jnp.abs(out)) if loss_reduction == "mean" else jnp.sum(jnp.abs(out))


if __name__ == "__main__":
    key = jax.random.PRNGKey(0)

    # (B, D_in, D_out, forced tile caps)
    configs = [
        (6, 32, 48, None, None),       # odd shapes: lane padding + row masking
        (300, 160, 200, 128, 128),     # multi-tile batch grid + D_out tiling + mask
        (256, 128, 128, None, None),   # fully aligned: no pad copy, no mask
    ]

    ok = True
    for (B, D_in, D_out, mr, mc) in configs:
        kx, kw, kb, key = jax.random.split(key, 4)
        x = jax.random.normal(kx, (B, D_in), dtype=jnp.float32)
        weight_t = (jax.random.uniform(kw, (D_in, D_out), dtype=jnp.float32) - 0.5) * 0.2
        bias = (jax.random.uniform(kb, (D_out,), dtype=jnp.float32) - 0.5) * 0.2

        for red in ("mean", "sum"):
            loss = model_with_loss_forward(
                x, weight_t, bias, loss_reduction=red,
                max_rows_per_tile=mr, max_cols_per_tile=mc)
            loss = jax.block_until_ready(loss)
            ref = _reference(x, weight_t, bias, red)
            if not jnp.allclose(loss, ref, rtol=1e-4, atol=1e-4):
                ok = False
                print("MISMATCH", B, D_in, D_out, red, float(loss), float(ref))

    assert ok
    print("KERNEL_OK")
</pallas_src>

<mosaic_0001>
module attributes {stable_mosaic.version = 11 : i64} {
  func.func @_linear_l1_partial_kernel(%arg0: i32, %arg1: i32, %arg2: memref<8x128xf32, #tpu.memory_space<vmem>>, %arg3: memref<128x128xf32, #tpu.memory_space<vmem>>, %arg4: memref<8x128xf32, #tpu.memory_space<vmem>>, %arg5: memref<8x128xf32, #tpu.memory_space<vmem>>) attributes {dimension_semantics = [#tpu.dimension_semantics<parallel>, #tpu.dimension_semantics<parallel>], iteration_bounds = array<i64: 1, 1>, scalar_prefetch = 0 : i64, scratch_operands = 0 : i64, tpu.core_type = #tpu.core_type<tc>, window_params = [{transform_indices = @transform_0, window_bounds = array<i64: 8, 128>}, {pipeline_mode = #tpu.pipeline_mode<synchronous>, transform_indices = @transform_1, window_bounds = array<i64: 128, 128>}, {pipeline_mode = #tpu.pipeline_mode<synchronous>, transform_indices = @transform_2, window_bounds = array<i64: 8, 128>}, {transform_indices = @transform_3, window_bounds = array<i64: 8, 128>}]} {
    %c0 = arith.constant 0 : index
    %c0_0 = arith.constant 0 : index
    %0 = vector.load %arg2[%c0, %c0_0] : memref<8x128xf32, #tpu.memory_space<vmem>>, vector<8x128xf32>
    %c0_1 = arith.constant 0 : index
    %c0_2 = arith.constant 0 : index
    %1 = vector.load %arg3[%c0_1, %c0_2] : memref<128x128xf32, #tpu.memory_space<vmem>>, vector<128x128xf32>
    %cst = arith.constant dense<0.000000e+00> : vector<8x128xf32>
    %2 = tpu.matmul %0, %1, %cst {dimension_numbers = #tpu.dot_dimension_numbers<[1], [0], [0], [1], [0, 0, 1, 1], [], []>} : vector<8x128xf32>, vector<128x128xf32>, vector<8x128xf32> -> vector<8x128xf32>
    %c0_3 = arith.constant 0 : index
    %c0_4 = arith.constant 0 : index
    %3 = vector.load %arg4[%c0_3, %c0_4] : memref<8x128xf32, #tpu.memory_space<vmem>>, vector<8x128xf32>
    %4 = arith.addf %2, %3 : vector<8x128xf32>
    %5 = math.absf %4 : vector<8x128xf32>
    %6 = tpu.iota {dimensions = array<i32: 0>} : vector<8x128xi32>
    %c6_i32 = arith.constant 6 : i32
    %7 = vector.broadcast %c6_i32 : i32 to vector<8x128xi32>
    %8 = arith.cmpi slt, %6, %7 : vector<8x128xi32>
    %cst_5 = arith.constant 0.000000e+00 : f32
    %9 = vector.broadcast %cst_5 : f32 to vector<8x128xf32>
    %10 = arith.select %8, %5, %9 : vector<8x128xi1>, vector<8x128xf32>
    %cst_6 = arith.constant 0.00347222225 : f32
    %11 = vector.broadcast %cst_6 : f32 to vector<8x128xf32>
    %12 = arith.mulf %10, %11 : vector<8x128xf32>
    %c0_7 = arith.constant 0 : index
    %c0_8 = arith.constant 0 : index
    %13 = vector.load %arg5[%c0_7, %c0_8] : memref<8x128xf32, #tpu.memory_space<vmem>>, vector<8x128xf32>
    tpu.vector_store %arg5[%c0_7, %c0_8], %12 {strides = array<i32>} : memref<8x128xf32, #tpu.memory_space<vmem>>, vector<8x128xf32>,
    return
  }
  func.func @transform_0(%arg0: i32, %arg1: i32) -> (i32, i32) {
    %c0_i32 = arith.constant 0 : i32
    %c0_i32_0 = arith.constant 0 : i32
    return %arg1, %c0_i32 : i32, i32
  }
  func.func @transform_1(%arg0: i32, %arg1: i32) -> (i32, i32) {
    %c0_i32 = arith.constant 0 : i32
    %c0_i32_0 = arith.constant 0 : i32
    return %c0_i32, %arg0 : i32, i32
  }
  func.func @transform_2(%arg0: i32, %arg1: i32) -> (i32, i32) {
    %c0_i32 = arith.constant 0 : i32
    %c0_i32_0 = arith.constant 0 : i32
    return %c0_i32, %arg0 : i32, i32
  }
  func.func @transform_3(%arg0: i32, %arg1: i32) -> (i32, i32) {
    %c0_i32 = arith.constant 0 : i32
    return %arg1, %arg0 : i32, i32
  }
}

module attributes {stable_mosaic.version = 11 : i64} {
  func.func @_linear_l1_partial_kernel(%arg0: i32, %arg1: i32, %arg2: memref<8x128xf32, #tpu.memory_space<vmem>>, %arg3: memref<128x128xf32, #tpu.memory_space<vmem>>, %arg4: memref<8x128xf32, #tpu.memory_space<vmem>>, %arg5: memref<8x128xf32, #tpu.memory_space<vmem>>) attributes {dimension_semantics = [#tpu.dimension_semantics<parallel>, #tpu.dimension_semantics<parallel>], iteration_bounds = array<i64: 1, 1>, scalar_prefetch = 0 : i64, scratch_operands = 0 : i64, tpu.core_type = #tpu.core_type<tc>, window_params = [{transform_indices = @transform_0, window_bounds = array<i64: 8, 128>}, {transform_indices = @transform_1, window_bounds = array<i64: 128, 128>}, {transform_indices = @transform_2, window_bounds = array<i64: 8, 128>}, {transform_indices = @transform_3, window_bounds = array<i64: 8, 128>}]} {
    %c0 = arith.constant 0 : index
    %c0_0 = arith.constant 0 : index
    %0 = vector.load %arg2[%c0, %c0_0] : memref<8x128xf32, #tpu.memory_space<vmem>>, vector<8x128xf32>
    %c0_1 = arith.constant 0 : index
    %c0_2 = arith.constant 0 : index
    %1 = vector.load %arg3[%c0_1, %c0_2] : memref<128x128xf32, #tpu.memory_space<vmem>>, vector<128x128xf32>
    %cst = arith.constant dense<0.000000e+00> : vector<8x128xf32>
    %2 = tpu.matmul %0, %1, %cst {dimension_numbers = #tpu.dot_dimension_numbers<[1], [0], [0], [1], [0, 0, 1, 1], [], []>} : vector<8x128xf32>, vector<128x128xf32>, vector<8x128xf32> -> vector<8x128xf32>
    %c0_3 = arith.constant 0 : index
    %c0_4 = arith.constant 0 : index
    %3 = vector.load %arg4[%c0_3, %c0_4] : memref<8x128xf32, #tpu.memory_space<vmem>>, vector<8x128xf32>
    %4 = arith.addf %2, %3 : vector<8x128xf32>
    %5 = math.absf %4 : vector<8x128xf32>
    %6 = tpu.iota {dimensions = array<i32: 0>} : vector<8x128xi32>
    %c6_i32 = arith.constant 6 : i32
    %7 = vector.broadcast %c6_i32 : i32 to vector<8x128xi32>
    %8 = arith.cmpi slt, %6, %7 : vector<8x128xi32>
    %cst_5 = arith.constant 0.000000e+00 : f32
    %9 = vector.broadcast %cst_5 : f32 to vector<8x128xf32>
    %10 = arith.select %8, %5, %9 : vector<8x128xi1>, vector<8x128xf32>
    %cst_6 = arith.constant 0.00347222225 : f32
    %11 = vector.broadcast %cst_6 : f32 to vector<8x128xf32>
    %12 = arith.mulf %10, %11 : vector<8x128xf32>
    %c0_7 = arith.constant 0 : index
    %c0_8 = arith.constant 0 : index
    %13 = vector.load %arg5[%c0_7, %c0_8] : memref<8x128xf32, #tpu.memory_space<vmem>>, vector<8x128xf32>
    tpu.vector_store %arg5[%c0_7, %c0_8], %12 {strides = array<i32>} : memref<8x128xf32, #tpu.memory_space<vmem>>, vector<8x128xf32>,
    return
  }
  func.func @transform_0(%arg0: i32, %arg1: i32) -> (i32, i32) {
    %c0_i32 = arith.constant 0 : i32
    %c0_i32_0 = arith.constant 0 : i32
    return %arg1, %c0_i32 : i32, i32
  }
  func.func @transform_1(%arg0: i32, %arg1: i32) -> (i32, i32) {
    %c0_i32 = arith.constant 0 : i32
    %c0_i32_0 = arith.constant 0 : i32
    return %c0_i32, %arg0 : i32, i32
  }
  func.func @transform_2(%arg0: i32, %arg1: i32) -> (i32, i32) {
    %c0_i32 = arith.constant 0 : i32
    %c0_i32_0 = arith.constant 0 : i32
    return %c0_i32, %arg0 : i32, i32
  }
  func.func @transform_3(%arg0: i32, %arg1: i32) -> (i32, i32) {
    %c0_i32 = arith.constant 0 : i32
    return %arg1, %arg0 : i32, i32
  }
}

</mosaic_0001>

<bundles_post_ra>
// kernel: tpu_custom_call.1
= control target key start
LH: loop header
LB: loop body
LE: loop exit
PB: predicated region body
PF: predicated region fallthrough
CT: control target
= control target key end

     0   :  { %8 = vsyncpa [#allocation3], 0  ;;  %s419_s0 = inlined_call_operand.hbm [shape: f32[8,128], index: 0, kind: input, shape index: {}]   ;;  %s420_s1 = inlined_call_operand.hbm [shape: f32[128,128], index: 1, kind: input, shape index: {}]   ;;  %s421_s2 = inlined_call_operand.hbm [shape: f32[8,128], index: 2, kind: input, shape index: {}]   ;;  %s422_s3 = inlined_call_operand.hbm [shape: f32[8,128], index: 3, kind: output, shape index: {}]  }
   0x1   :  { %9 = vsyncpa [#allocation6], 0 }
   0x2   :  { %10 = vsyncpa [#allocation4], 0  ;;  %s342_s12 = smov [#allocation5]   ;;  %s248_s16 = scalar_lea.hbm %s420_s1, 2048 }
   0x3   :  { %s26_s13 = sshll.u32 %s342_s12, 4  ;;  %p249_p0 = scmp.ne.s32.totalorder %s420_s1, %s248_s16  ;;  %s27_s13 = int_to_ptr.vmem [resolvable:$true] %s26_s13 }
   0x4   :  { %p252_p1 = scmp.lt.u32.totalorder %s248_s16, %s420_s1 }
   0x6   :  { %p254_p2 = pnand %p252_p1, %p249_p0 }
   0x8   :  { %257 = shalt.err (!%p254_p2)
}
   0x9   :  { %s258_s21 = scalar_lea.vmem %s27_s13, 2048  ;;  %p263_p4 = scmp.lt.s32.totalorder %s27_s13, %s27_s13 }
   0xa   :  { %p259_p3 = scmp.ne.s32.totalorder %s27_s13, %s258_s21  ;;  %p264_p5 = scmp.lt.s32.totalorder %s258_s21, %s258_s21 }
   0xc   :  { %p265_p6 = por %p264_p5, %p263_p4 }
   0xe   :  { %p266_p7 = pnand %p265_p6, %p259_p3 }
  0x10   :  { %269 = shalt.err (!%p266_p7)
}
  0x11   :  { %s343_s22 = smov 128   ;;  %s344_s23 = smov 8  }
  0x12   :  { %32 = dma.hbm_to_vmem [thread:$0]  %s420_s1, 2048, %s27_s13, [#allocation6], %s343_s22, %s343_s22, %s344_s23  }
  0x13   :  { %s345_s26 = smov [#allocation2]   ;;  %s346_s28 = smov [#allocation7]  }
  0x14   :  { %s17_s27 = sshll.u32 %s345_s26, 4  ;;  %s39_s29 = sshll.u32 %s346_s28, 4  ;;  %s18_s27 = int_to_ptr.vmem [resolvable:$true] %s17_s27  ;;  %s40_s29 = int_to_ptr.vmem [resolvable:$true] %s39_s29 }
  0x15   :  { %s270_s5 = scalar_lea.hbm %s419_s0, 128 }
  0x16   :  { %p271_p8 = scmp.ne.s32.totalorder %s419_s0, %s270_s5  ;;  %p274_p9 = scmp.lt.u32.totalorder %s270_s5, %s419_s0 }
  0x18   :  { %p276_p10 = pnand %p274_p9, %p271_p8 }
  0x1a   :  { %279 = shalt.err (!%p276_p10)
}
  0x1b   :  { %s280_s1 = scalar_lea.vmem %s18_s27, 128  ;;  %p285_p12 = scmp.lt.s32.totalorder %s18_s27, %s18_s27 }
  0x1c   :  { %p281_p11 = scmp.ne.s32.totalorder %s18_s27, %s280_s1  ;;  %p286_p13 = scmp.lt.s32.totalorder %s280_s1, %s280_s1 }
  0x1e   :  { %p287_p0 = por %p286_p13, %p285_p12 }
  0x20   :  { %p288_p1 = pnand %p287_p0, %p281_p11 }
  0x22   :  { %291 = shalt.err (!%p288_p1)
}
  0x23   :  { %20 = dma.hbm_to_vmem [thread:$0]  %s419_s0, 128, %s18_s27, [#allocation3]  }
  0x24   :  { %s292_s14 = scalar_lea.hbm %s421_s2, 128 }
  0x25   :  { %p293_p2 = scmp.ne.s32.totalorder %s421_s2, %s292_s14  ;;  %p296_p3 = scmp.lt.u32.totalorder %s292_s14, %s421_s2 }
  0x27   :  { %p298_p4 = pnand %p296_p3, %p293_p2 }
  0x29   :  { %301 = shalt.err (!%p298_p4)
}
  0x2a   :  { %s302_s19 = scalar_lea.vmem %s40_s29, 128  ;;  %p307_p6 = scmp.lt.s32.totalorder %s40_s29, %s40_s29 }
  0x2b   :  { %p303_p5 = scmp.ne.s32.totalorder %s40_s29, %s302_s19  ;;  %p308_p7 = scmp.lt.s32.totalorder %s302_s19, %s302_s19 }
  0x2d   :  { %p309_p8 = por %p308_p7, %p307_p6 }
  0x2f   :  { %p310_p9 = pnand %p309_p8, %p303_p5 }
  0x31   :  { %313 = shalt.err (!%p310_p9)
}
  0x32   :  { %42 = dma.hbm_to_vmem [thread:$0]  %s421_s2, 128, %s40_s29, [#allocation6]  }
  0x33   :  { %336 = dma.done.wait [#allocation3], 128  }
  0x34   :  { %337 = vsyncadd [#allocation3], 4294967168 }
  0x35   :  { %338 = dma.done.wait [#allocation6], 2176  }
  0x36   :  { %339 = vsyncadd [#allocation6], 4294965120  ;;  %v347_v0 = vmov 0.0|0.0   ;;  %vm348_vm0 = vmmov 0   ;;  %v349_v1 = vmov 0.0   ;;  %v53_v2 = vld [vmem:[#allocation5] sm:$0xff]  ;;  %v141_v27 = vlaneseq }
  0x37   :  { %215 = vmatprep.subr.bf16.mxu0 %v347_v0  ;;  %212 = vmatprep.mubr.msk.f32.mxu0 %vm348_vm0, %v349_v1  ;;  %v54_v3 = vld [vmem:[#allocation5 + $0x8] sm:$0xff]  ;;  %v55_v4 = vld [vmem:[#allocation5 + $0x10] sm:$0xff]  ;;  %v56_v6 = vld [vmem:[#allocation5 + $0x18] sm:$0xff]  ;;  %s350_s2 = smov [#allocation8]  }
  0x38   :  { %v216_v5 = vpack.c.bf16 %v54_v3, %v53_v2  ;;  %v219_v7 = vpack.c.bf16 %v56_v6, %v55_v4  ;;  %v57_v8 = vld [vmem:[#allocation5 + $0x20] sm:$0xff]  ;;  %v58_v9 = vld [vmem:[#allocation5 + $0x28] sm:$0xff]  ;;  %v59_v11 = vld [vmem:[#allocation5 + $0x30] sm:$0xff]  ;;  %v142_v29 = vshrl.u32 %v141_v27, 7  ;;  %s153_s21 = sshll.u32 %s350_s2, 4  ;;  %s154_s21 = int_to_ptr.vmem [resolvable:$true] %s153_s21 }
  0x39   :  { %v222_v10 = vpack.c.bf16 %v58_v9, %v57_v8  ;;  %v60_v12 = vld [vmem:[#allocation5 + $0x38] sm:$0xff]  ;;  %v61_v14 = vld [vmem:[#allocation5 + $0x40] sm:$0xff]  ;;  %v62_v15 = vld [vmem:[#allocation5 + $0x48] sm:$0xff]  ;;  %s314_s22 = scalar_lea.vmem %s154_s21, 128  ;;  %p319_p11 = scmp.lt.s32.totalorder %s154_s21, %s154_s21 }
  0x3a   :  { %217 = vmatpush3.bf16.msra.mxu0 %v216_v5  ;;  %v225_v13 = vpack.c.bf16 %v60_v12, %v59_v11  ;;  %v228_v16 = vpack.c.bf16 %v62_v15, %v61_v14  ;;  %v63_v17 = vld [vmem:[#allocation5 + $0x50] sm:$0xff]  ;;  %v64_v18 = vld [vmem:[#allocation5 + $0x58] sm:$0xff]  ;;  %v65_v20 = vld [vmem:[#allocation5 + $0x60] sm:$0xff]  ;;  %vm143_vm1 = vcmp.lt.s32.totalorder %v142_v29, 6  ;;  %p315_p10 = scmp.ne.s32.totalorder %s154_s21, %s314_s22  ;;  %p320_p12 = scmp.lt.s32.totalorder %s314_s22, %s314_s22 }
  0x3b   :  { %218 = vmatprep.subr.bf16.mxu0 %v347_v0  ;;  %v231_v19 = vpack.c.bf16 %v64_v18, %v63_v17  ;;  %v66_v21 = vld [vmem:[#allocation5 + $0x68] sm:$0xff]  ;;  %v67_v23 = vld [vmem:[#allocation5 + $0x70] sm:$0xff]  ;;  %v68_v24 = vld [vmem:[#allocation5 + $0x78] sm:$0xff] }
  0x3c   :  { %v234_v22 = vpack.c.bf16 %v66_v21, %v65_v20  ;;  %v237_v25 = vpack.c.bf16 %v68_v24, %v67_v23  ;;  %v52_v26 = vld [vmem:[#allocation2] sm:$0xff]  ;;  %v69_v28 = vld [vmem:[#allocation7] sm:$0xff]  ;;  %p321_p13 = por %p320_p12, %p319_p11 }
  0x3e   :  { %220 = vmatpush3.bf16.msra.mxu0 %v219_v7  ;;  %p322_p0 = pnand %p321_p13, %p315_p10 }
  0x3f   :  { %221 = vmatprep.subr.bf16.mxu0 %v347_v0 }
  0x42   :  { %223 = vmatpush3.bf16.msra.mxu0 %v222_v10 }
  0x43   :  { %224 = vmatprep.subr.bf16.mxu0 %v347_v0 }
  0x46   :  { %226 = vmatpush3.bf16.msra.mxu0 %v225_v13 }
  0x47   :  { %227 = vmatprep.subr.bf16.mxu0 %v347_v0 }
  0x4a   :  { %229 = vmatpush3.bf16.msra.mxu0 %v228_v16 }
  0x4b   :  { %230 = vmatprep.subr.bf16.mxu0 %v347_v0 }
  0x4e   :  { %232 = vmatpush3.bf16.msra.mxu0 %v231_v19 }
  0x4f   :  { %233 = vmatprep.subr.bf16.mxu0 %v347_v0 }
  0x52   :  { %235 = vmatpush3.bf16.msra.mxu0 %v234_v22 }
  0x53   :  { %236 = vmatprep.subr.bf16.mxu0 %v347_v0 }
  0x56   :  { %238 = vmatpush3.bf16.msra.mxu0 %v237_v25 }
  0x59   :  { %213 = vmatmul.mubr.f32.vlgmr.msra.gmra.mrb[0].mxu0 %v52_v26 }
 0x12c   :  { %v136_v30 = vpop.f32.mrb[0].mxu0 }
 0x12d   :  { %v137_v31 = vadd.f32 %v136_v30, %v69_v28  ;;  %v214_v32 = vpop.f32.mrb[1].mxu0 }
 0x12f   :  { %v140_v33 = vand.u32 2147483647, %v137_v31 }
 0x131   :  { %v144_v34 = vsel %vm143_vm1, %v140_v33, 0.0 }
 0x132   :  { %v145_v35 = vmul.f32 0.0034722222, %v144_v34 }
 0x134   :  { %146 = vst [vmem:[#allocation8] sm:$0xff] %v145_v35 }
 0x135   :  { %325 = shalt.err (!%p322_p0)
}
 0x136   :  { %s326_s25 = scalar_lea.hbm %s422_s3, 128 }
 0x137   :  { %p327_p1 = scmp.ne.s32.totalorder %s422_s3, %s326_s25  ;;  %p330_p2 = scmp.lt.u32.totalorder %s326_s25, %s422_s3 }
 0x139   :  { %p332_p3 = pnand %p330_p2, %p327_p1 }
 0x13b   :  { %335 = shalt.err (!%p332_p3)
}
 0x13c   :  { %156 = dma.vmem_to_hbm [thread:$0]  %s154_s21, 128, %s422_s3, [#allocation4]  }
 0x13d   :  { %340 = dma.done.wait [#allocation4], 128  }
 0x13e   :  { %341 = vsyncadd [#allocation4], 4294967168 }
 0x13f   :  { %160 = vsyncpa [#allocation3], 1 }
 0x140   :  { %161 = vsyncpa [#allocation6], 1 }
 0x141   :  { %162 = vsyncpa [#allocation4], 1 }

// kernel: tpu_custom_call.1
= control target key start
LH: loop header
LB: loop body
LE: loop exit
PB: predicated region body
PF: predicated region fallthrough
CT: control target
= control target key end

     0   :  { %8 = vsyncpa [#allocation3], 0  ;;  %s419_s0 = inlined_call_operand.hbm [shape: f32[8,128], index: 0, kind: input, shape index: {}]   ;;  %s420_s1 = inlined_call_operand.hbm [shape: f32[128,128], index: 1, kind: input, shape index: {}]   ;;  %s421_s2 = inlined_call_operand.hbm [shape: f32[8,128], index: 2, kind: input, shape index: {}]   ;;  %s422_s3 = inlined_call_operand.hbm [shape: f32[8,128], index: 3, kind: output, shape index: {}]  }
   0x1   :  { %9 = vsyncpa [#allocation6], 0 }
   0x2   :  { %10 = vsyncpa [#allocation4], 0  ;;  %s342_s12 = smov [#allocation5]   ;;  %s248_s16 = scalar_lea.hbm %s420_s1, 2048 }
   0x3   :  { %s26_s13 = sshll.u32 %s342_s12, 4  ;;  %p249_p0 = scmp.ne.s32.totalorder %s420_s1, %s248_s16  ;;  %s27_s13 = int_to_ptr.vmem [resolvable:$true] %s26_s13 }
   0x4   :  { %p252_p1 = scmp.lt.u32.totalorder %s248_s16, %s420_s1 }
   0x6   :  { %p254_p2 = pnand %p252_p1, %p249_p0 }
   0x8   :  { %257 = shalt.err (!%p254_p2)
}
   0x9   :  { %s258_s21 = scalar_lea.vmem %s27_s13, 2048  ;;  %p263_p4 = scmp.lt.s32.totalorder %s27_s13, %s27_s13 }
   0xa   :  { %p259_p3 = scmp.ne.s32.totalorder %s27_s13, %s258_s21  ;;  %p264_p5 = scmp.lt.s32.totalorder %s258_s21, %s258_s21 }
   0xc   :  { %p265_p6 = por %p264_p5, %p263_p4 }
   0xe   :  { %p266_p7 = pnand %p265_p6, %p259_p3 }
  0x10   :  { %269 = shalt.err (!%p266_p7)
}
  0x11   :  { %s343_s22 = smov 128   ;;  %s344_s23 = smov 8  }
  0x12   :  { %32 = dma.hbm_to_vmem [thread:$0]  %s420_s1, 2048, %s27_s13, [#allocation6], %s343_s22, %s343_s22, %s344_s23  }
  0x13   :  { %s345_s26 = smov [#allocation2]   ;;  %s346_s28 = smov [#allocation7]  }
  0x14   :  { %s17_s27 = sshll.u32 %s345_s26, 4  ;;  %s39_s29 = sshll.u32 %s346_s28, 4  ;;  %s18_s27 = int_to_ptr.vmem [resolvable:$true] %s17_s27  ;;  %s40_s29 = int_to_ptr.vmem [resolvable:$true] %s39_s29 }
  0x15   :  { %s270_s5 = scalar_lea.hbm %s419_s0, 128 }
  0x16   :  { %p271_p8 = scmp.ne.s32.totalorder %s419_s0, %s270_s5  ;;  %p274_p9 = scmp.lt.u32.totalorder %s270_s5, %s419_s0 }
  0x18   :  { %p276_p10 = pnand %p274_p9, %p271_p8 }
  0x1a   :  { %279 = shalt.err (!%p276_p10)
}
  0x1b   :  { %s280_s1 = scalar_lea.vmem %s18_s27, 128  ;;  %p285_p12 = scmp.lt.s32.totalorder %s18_s27, %s18_s27 }
  0x1c   :  { %p281_p11 = scmp.ne.s32.totalorder %s18_s27, %s280_s1  ;;  %p286_p13 = scmp.lt.s32.totalorder %s280_s1, %s280_s1 }
  0x1e   :  { %p287_p0 = por %p286_p13, %p285_p12 }
  0x20   :  { %p288_p1 = pnand %p287_p0, %p281_p11 }
  0x22   :  { %291 = shalt.err (!%p288_p1)
}
  0x23   :  { %20 = dma.hbm_to_vmem [thread:$0]  %s419_s0, 128, %s18_s27, [#allocation3]  }
  0x24   :  { %s292_s14 = scalar_lea.hbm %s421_s2, 128 }
  0x25   :  { %p293_p2 = scmp.ne.s32.totalorder %s421_s2, %s292_s14  ;;  %p296_p3 = scmp.lt.u32.totalorder %s292_s14, %s421_s2 }
  0x27   :  { %p298_p4 = pnand %p296_p3, %p293_p2 }
  0x29   :  { %301 = shalt.err (!%p298_p4)
}
  0x2a   :  { %s302_s19 = scalar_lea.vmem %s40_s29, 128  ;;  %p307_p6 = scmp.lt.s32.totalorder %s40_s29, %s40_s29 }
  0x2b   :  { %p303_p5 = scmp.ne.s32.totalorder %s40_s29, %s302_s19  ;;  %p308_p7 = scmp.lt.s32.totalorder %s302_s19, %s302_s19 }
  0x2d   :  { %p309_p8 = por %p308_p7, %p307_p6 }
  0x2f   :  { %p310_p9 = pnand %p309_p8, %p303_p5 }
  0x31   :  { %313 = shalt.err (!%p310_p9)
}
  0x32   :  { %42 = dma.hbm_to_vmem [thread:$0]  %s421_s2, 128, %s40_s29, [#allocation6]  }
  0x33   :  { %336 = dma.done.wait [#allocation3], 128  }
  0x34   :  { %337 = vsyncadd [#allocation3], 4294967168 }
  0x35   :  { %338 = dma.done.wait [#allocation6], 2176  }
  0x36   :  { %339 = vsyncadd [#allocation6], 4294965120  ;;  %v347_v0 = vmov 0.0|0.0   ;;  %vm348_vm0 = vmmov 0   ;;  %v349_v1 = vmov 0.0   ;;  %v53_v2 = vld [vmem:[#allocation5] sm:$0xff]  ;;  %v141_v27 = vlaneseq }
  0x37   :  { %215 = vmatprep.subr.bf16.mxu0 %v347_v0  ;;  %212 = vmatprep.mubr.msk.f32.mxu0 %vm348_vm0, %v349_v1  ;;  %v54_v3 = vld [vmem:[#allocation5 + $0x8] sm:$0xff]  ;;  %v55_v4 = vld [vmem:[#allocation5 + $0x10] sm:$0xff]  ;;  %v56_v6 = vld [vmem:[#allocation5 + $0x18] sm:$0xff]  ;;  %s350_s2 = smov [#allocation8]  }
  0x38   :  { %v216_v5 = vpack.c.bf16 %v54_v3, %v53_v2  ;;  %v219_v7 = vpack.c.bf16 %v56_v6, %v55_v4  ;;  %v57_v8 = vld [vmem:[#allocation5 + $0x20] sm:$0xff]  ;;  %v58_v9 = vld [vmem:[#allocation5 + $0x28] sm:$0xff]  ;;  %v59_v11 = vld [vmem:[#allocation5 + $0x30] sm:$0xff]  ;;  %v142_v29 = vshrl.u32 %v141_v27, 7  ;;  %s153_s21 = sshll.u32 %s350_s2, 4  ;;  %s154_s21 = int_to_ptr.vmem [resolvable:$true] %s153_s21 }
  0x39   :  { %v222_v10 = vpack.c.bf16 %v58_v9, %v57_v8  ;;  %v60_v12 = vld [vmem:[#allocation5 + $0x38] sm:$0xff]  ;;  %v61_v14 = vld [vmem:[#allocation5 + $0x40] sm:$0xff]  ;;  %v62_v15 = vld [vmem:[#allocation5 + $0x48] sm:$0xff]  ;;  %s314_s22 = scalar_lea.vmem %s154_s21, 128  ;;  %p319_p11 = scmp.lt.s32.totalorder %s154_s21, %s154_s21 }
  0x3a   :  { %217 = vmatpush3.bf16.msra.mxu0 %v216_v5  ;;  %v225_v13 = vpack.c.bf16 %v60_v12, %v59_v11  ;;  %v228_v16 = vpack.c.bf16 %v62_v15, %v61_v14  ;;  %v63_v17 = vld [vmem:[#allocation5 + $0x50] sm:$0xff]  ;;  %v64_v18 = vld [vmem:[#allocation5 + $0x58] sm:$0xff]  ;;  %v65_v20 = vld [vmem:[#allocation5 + $0x60] sm:$0xff]  ;;  %vm143_vm1 = vcmp.lt.s32.totalorder %v142_v29, 6  ;;  %p315_p10 = scmp.ne.s32.totalorder %s154_s21, %s314_s22  ;;  %p320_p12 = scmp.lt.s32.totalorder %s314_s22, %s314_s22 }
  0x3b   :  { %218 = vmatprep.subr.bf16.mxu0 %v347_v0  ;;  %v231_v19 = vpack.c.bf16 %v64_v18, %v63_v17  ;;  %v66_v21 = vld [vmem:[#allocation5 + $0x68] sm:$0xff]  ;;  %v67_v23 = vld [vmem:[#allocation5 + $0x70] sm:$0xff]  ;;  %v68_v24 = vld [vmem:[#allocation5 + $0x78] sm:$0xff] }
  0x3c   :  { %v234_v22 = vpack.c.bf16 %v66_v21, %v65_v20  ;;  %v237_v25 = vpack.c.bf16 %v68_v24, %v67_v23  ;;  %v52_v26 = vld [vmem:[#allocation2] sm:$0xff]  ;;  %v69_v28 = vld [vmem:[#allocation7] sm:$0xff]  ;;  %p321_p13 = por %p320_p12, %p319_p11 }
  0x3e   :  { %220 = vmatpush3.bf16.msra.mxu0 %v219_v7  ;;  %p322_p0 = pnand %p321_p13, %p315_p10 }
  0x3f   :  { %221 = vmatprep.subr.bf16.mxu0 %v347_v0 }
  0x42   :  { %223 = vmatpush3.bf16.msra.mxu0 %v222_v10 }
  0x43   :  { %224 = vmatprep.subr.bf16.mxu0 %v347_v0 }
  0x46   :  { %226 = vmatpush3.bf16.msra.mxu0 %v225_v13 }
  0x47   :  { %227 = vmatprep.subr.bf16.mxu0 %v347_v0 }
  0x4a   :  { %229 = vmatpush3.bf16.msra.mxu0 %v228_v16 }
  0x4b   :  { %230 = vmatprep.subr.bf16.mxu0 %v347_v0 }
  0x4e   :  { %232 = vmatpush3.bf16.msra.mxu0 %v231_v19 }
  0x4f   :  { %233 = vmatprep.subr.bf16.mxu0 %v347_v0 }
  0x52   :  { %235 = vmatpush3.bf16.msra.mxu0 %v234_v22 }
  0x53   :  { %236 = vmatprep.subr.bf16.mxu0 %v347_v0 }
  0x56   :  { %238 = vmatpush3.bf16.msra.mxu0 %v237_v25 }
  0x59   :  { %213 = vmatmul.mubr.f32.vlgmr.msra.gmra.mrb[0].mxu0 %v52_v26 }
 0x12c   :  { %v136_v30 = vpop.f32.mrb[0].mxu0 }
 0x12d   :  { %v137_v31 = vadd.f32 %v136_v30, %v69_v28  ;;  %v214_v32 = vpop.f32.mrb[1].mxu0 }
 0x12f   :  { %v140_v33 = vand.u32 2147483647, %v137_v31 }
 0x131   :  { %v144_v34 = vsel %vm143_vm1, %v140_v33, 0.0 }
 0x132   :  { %v145_v35 = vmul.f32 0.0034722222, %v144_v34 }
 0x134   :  { %146 = vst [vmem:[#allocation8] sm:$0xff] %v145_v35 }
 0x135   :  { %325 = shalt.err (!%p322_p0)
}
 0x136   :  { %s326_s25 = scalar_lea.hbm %s422_s3, 128 }
 0x137   :  { %p327_p1 = scmp.ne.s32.totalorder %s422_s3, %s326_s25  ;;  %p330_p2 = scmp.lt.u32.totalorder %s326_s25, %s422_s3 }
 0x139   :  { %p332_p3 = pnand %p330_p2, %p327_p1 }
 0x13b   :  { %335 = shalt.err (!%p332_p3)
}
 0x13c   :  { %156 = dma.vmem_to_hbm [thread:$0]  %s154_s21, 128, %s422_s3, [#allocation4]  }
 0x13d   :  { %340 = dma.done.wait [#allocation4], 128  }
 0x13e   :  { %341 = vsyncadd [#allocation4], 4294967168 }
 0x13f   :  { %160 = vsyncpa [#allocation3], 1 }
 0x140   :  { %161 = vsyncpa [#allocation6], 1 }
 0x141   :  { %162 = vsyncpa [#allocation4], 1 }

</bundles_post_ra>
